<compile_context>
chip_gen: v6e
topology: v6e:2x2x1
jax: 0.10.0
libtpu: 0.0.40
codegen_flags: <defaults>
</compile_context>

<pallas_src>
import functools
import math

import jax
import jax.numpy as jnp
from jax.experimental import pallas as pl
from jax.experimental.pallas import tpu as pltpu


def _layernorm(x, gamma, beta, eps=1e-5):
    # Two-pass LayerNorm (mean, then centered variance) — avoids the
    # catastrophic-cancellation risk of var = E[x^2] - E[x]^2.
    mean = jnp.mean(x, axis=-1, keepdims=True)
    xc = x - mean
    var = jnp.mean(xc * xc, axis=-1, keepdims=True)
    return xc * jax.lax.rsqrt(var + eps) * gamma + beta


# ----------------------------------------------------------------------------
# Stage 1: pre_norm + Q/K/V projection + q_norm/k_norm (runs once per seq tile)
# ----------------------------------------------------------------------------
def qkv_proj_kernel(x_ref, wq_ref, wk_ref, wv_ref,
                    gp_ref, bp_ref, gq_ref, bq_ref, gk_ref, bk_ref,
                    q_ref, k_ref, v_ref, *, scale, compute_dtype):
    cd = compute_dtype
    xn = _layernorm(x_ref[0].astype(jnp.float32), gp_ref[...], bp_ref[...])
    xn_c = xn.astype(cd)

    q = jnp.dot(xn_c, wq_ref[...], preferred_element_type=jnp.float32)
    k = jnp.dot(xn_c, wk_ref[...], preferred_element_type=jnp.float32)
    v = jnp.dot(xn_c, wv_ref[...], preferred_element_type=jnp.float32)

    # q_norm / k_norm in f32; fold 1/sqrt(dim) into Q here (TQ*C multiplies
    # instead of H*TQ*N multiplies on the score tensor later).
    q = _layernorm(q, gq_ref[...], bq_ref[...]) * scale
    k = _layernorm(k, gk_ref[...], bk_ref[...])

    q_ref[0] = q.astype(q_ref.dtype)
    k_ref[0] = k.astype(k_ref.dtype)
    v_ref[0] = v.astype(v_ref.dtype)


# ----------------------------------------------------------------------------
# Stage 2: flash-style attention + fused output projection
# ----------------------------------------------------------------------------
def flash_attn_kernel(q_ref, k_ref, v_ref, wo_ref, bo_ref, o_ref,
                      m_sc, l_sc, acc_sc, *,
                      heads, dim, n_valid, n_total, compute_dtype):
    cd = compute_dtype
    d = dim // heads
    kv_i = pl.program_id(2)

    @pl.when(kv_i == 0)
    def _():
        m_sc[...] = jnp.full_like(m_sc, -jnp.inf)
        l_sc[...] = jnp.zeros_like(l_sc)
        acc_sc[...] = jnp.zeros_like(acc_sc)

    tq = q_ref.shape[1]
    tk = k_ref.shape[1]

    qh = q_ref[0].reshape(tq, heads, d)          # already scaled, compute dtype
    kh = k_ref[0].reshape(tk, heads, d)
    vh = v_ref[0].reshape(tk, heads, d)

    # (H, TQ, TK) scores, f32 accumulation on the MXU.
    s = jnp.einsum('nhd,mhd->hnm', qh, kh, preferred_element_type=jnp.float32)

    if n_valid < n_total:  # static: mask padded K/V positions only when padded
        pos = kv_i * tk + jax.lax.broadcasted_iota(jnp.int32, (1, 1, tk), 2)
        s = jnp.where(pos < n_valid, s, -1e30)

    m_prev = m_sc[...]
    m_new = jnp.maximum(m_prev, jnp.max(s, axis=-1, keepdims=True))
    alpha = jnp.exp(m_prev - m_new)
    p = jnp.exp(s - m_new)                                   # f32 softmax
    l_sc[...] = alpha * l_sc[...] + jnp.sum(p, axis=-1, keepdims=True)
    acc_sc[...] = alpha * acc_sc[...] + jnp.einsum(
        'hnm,mhd->hnd', p.astype(cd), vh, preferred_element_type=jnp.float32)
    m_sc[...] = m_new

    @pl.when(kv_i == pl.num_programs(2) - 1)
    def _():
        inv_l = 1.0 / l_sc[...]                              # exact f32 reciprocal
        out = acc_sc[...] * inv_l                            # (H, TQ, d)
        out = jnp.swapaxes(out, 0, 1).reshape(tq, dim)       # (TQ, C), once per q tile
        out = jnp.dot(out.astype(cd), wo_ref[...],
                      preferred_element_type=jnp.float32) + bo_ref[...]
        # path_drop is identity in eval mode
        o_ref[0] = out.astype(o_ref.dtype)


# ----------------------------------------------------------------------------
# Wrapper
# ----------------------------------------------------------------------------
def _round_up(a, b):
    return -(-a // b) * b


def _gen_defaults():
    """Generation-aware (default q_tile, vmem_limit_bytes)."""
    try:
        kind = jax.devices()[0].device_kind.lower()
    except Exception:
        kind = ""
    if "v7" in kind:
        return 128, 56 << 20      # 64 MiB physical VMEM per TensorCore
    if "v5" in kind or "v6" in kind:
        return 256, 96 << 20      # 128 MiB physical VMEM
    return 128, None              # unknown generation: compiler default limit


def mhsa_forward(x, params, heads, *, q_tile=None, kv_tile=None,
                 compute_dtype=jnp.bfloat16, vmem_limit_bytes=None):
    B, N, C = x.shape
    assert C % heads == 0
    (wq, wk, wv, wo, bo, gp, bp, gq, bq, gk, bk) = params
    cd = compute_dtype

    default_qt, default_vmem = _gen_defaults()
    if vmem_limit_bytes is None:
        vmem_limit_bytes = default_vmem
    if q_tile is None:
        q_tile = default_qt if N >= default_qt else _round_up(N, 8)
    if kv_tile is None:
        kv_tile = min(512, _round_up(N, q_tile))

    # Pad the sequence so both tile sizes divide it; padded K/V rows are masked
    # in the kernel and padded Q rows are sliced off below.
    n_pad = _round_up(N, math.lcm(q_tile, kv_tile))
    x_p = x if n_pad == N else jnp.pad(x, ((0, 0), (0, n_pad - N), (0, 0)))

    # Pre-transpose PyTorch (out, in) weights ONCE; cast to the MXU dtype.
    wq_t = jnp.asarray(wq.T, dtype=cd)
    wk_t = jnp.asarray(wk.T, dtype=cd)
    wv_t = jnp.asarray(wv.T, dtype=cd)
    wo_t = jnp.asarray(wo.T, dtype=cd)

    scale = 1.0 / (C ** 0.5)   # module divides scores by sqrt(dim), not sqrt(head_dim)

    def const_spec(shape):
        # Constant-index block: single-buffered (no point double-buffering a
        # block whose index never changes — saves its VMEM footprint).
        nd = len(shape)
        return pl.BlockSpec(shape, lambda *args, _nd=nd: (0,) * _nd,
                            pipeline_mode=pl.Buffered(1))

    cparams = dict(vmem_limit_bytes=vmem_limit_bytes)

    # ---- Stage 1: Q/K/V projection, once per (batch, seq tile) --------------
    proj_tile = kv_tile
    proj = functools.partial(qkv_proj_kernel, scale=scale, compute_dtype=cd)
    q_full, k_full, v_full = pl.pallas_call(
        proj,
        out_shape=[jax.ShapeDtypeStruct((B, n_pad, C), cd)] * 3,
        grid=(B, n_pad // proj_tile),
        in_specs=[
            pl.BlockSpec((1, proj_tile, C), lambda b, si: (b, si, 0)),
            const_spec((C, C)),     # Wq^T
            const_spec((C, C)),     # Wk^T
            const_spec((C, C)),     # Wv^T
            const_spec((1, C)), const_spec((1, C)),   # pre_norm gamma/beta
            const_spec((1, C)), const_spec((1, C)),   # q_norm gamma/beta
            const_spec((1, C)), const_spec((1, C)),   # k_norm gamma/beta
        ],
        out_specs=[pl.BlockSpec((1, proj_tile, C), lambda b, si: (b, si, 0))] * 3,
        compiler_params=pltpu.CompilerParams(
            dimension_semantics=("parallel", "parallel"), **cparams),
    )(x_p, wq_t, wk_t, wv_t, gp, bp, gq, bq, gk, bk)

    # ---- Stage 2: flash attention + fused output projection -----------------
    nq = n_pad // q_tile
    nkv = n_pad // kv_tile
    d = C // heads
    attn = functools.partial(flash_attn_kernel, heads=heads, dim=C,
                             n_valid=N, n_total=n_pad, compute_dtype=cd)
    out = pl.pallas_call(
        attn,
        out_shape=jax.ShapeDtypeStruct((B, n_pad, C), x.dtype),
        grid=(B, nq, nkv),
        in_specs=[
            pl.BlockSpec((1, q_tile, C), lambda b, qi, ki: (b, qi, 0)),
            pl.BlockSpec((1, kv_tile, C), lambda b, qi, ki: (b, ki, 0)),
            pl.BlockSpec((1, kv_tile, C), lambda b, qi, ki: (b, ki, 0)),
            const_spec((C, C)),     # Wo^T
            const_spec((1, C)),     # to_out bias
        ],
        out_specs=pl.BlockSpec((1, q_tile, C), lambda b, qi, ki: (b, qi, 0)),
        scratch_shapes=[
            pltpu.VMEM((heads, q_tile, 1), jnp.float32),   # running max
            pltpu.VMEM((heads, q_tile, 1), jnp.float32),   # running sum
            pltpu.VMEM((heads, q_tile, d), jnp.float32),   # output accumulator
        ],
        compiler_params=pltpu.CompilerParams(
            dimension_semantics=("parallel", "parallel", "arbitrary"), **cparams),
    )(q_full, k_full, v_full, wo_t, bo)

    return out if n_pad == N else out[:, :N, :]


# ----------------------------------------------------------------------------
# Pure-JAX reference mirroring the PyTorch forward (eval mode)
# ----------------------------------------------------------------------------
def mhsa_reference(x, params, heads):
    (wq, wk, wv, wo, bo, gp, bp, gq, bq, gk, bk) = params
    B, N, C = x.shape
    d = C // heads

    def ln(t, g, b, eps=1e-5):
        m = jnp.mean(t, axis=-1, keepdims=True)
        v = jnp.mean((t - m) ** 2, axis=-1, keepdims=True)
        return (t - m) * jax.lax.rsqrt(v + eps) * g + b

    xn = ln(x, gp[0], bp[0])
    q = ln(xn @ wq.T, gq[0], bq[0])
    k = ln(xn @ wk.T, gk[0], bk[0])
    v = xn @ wv.T
    q = q.reshape(B, N, heads, d).transpose(0, 2, 1, 3)
    k = k.reshape(B, N, heads, d).transpose(0, 2, 1, 3)
    v = v.reshape(B, N, heads, d).transpose(0, 2, 1, 3)
    score = (q @ jnp.swapaxes(k, -2, -1)) / (C ** 0.5)
    attn = jax.nn.softmax(score, axis=-1)
    out = (attn @ v).transpose(0, 2, 1, 3).reshape(B, N, C)
    return out @ wo.T + bo[0]


if __name__ == "__main__":
    B, N, dim, heads = 2, 8, 32, 8

    key = jax.random.PRNGKey(0)
    kx, kq, kk, kv, ko = jax.random.split(key, 5)

    x = jax.random.normal(kx, (B, N, dim), dtype=jnp.float32)

    # Deterministic init mirroring nn.init.normal_(std=0.02) / LayerNorm defaults.
    wq = 0.02 * jax.random.normal(kq, (dim, dim), dtype=jnp.float32)
    wk = 0.02 * jax.random.normal(kk, (dim, dim), dtype=jnp.float32)
    wv = 0.02 * jax.random.normal(kv, (dim, dim), dtype=jnp.float32)
    wo = 0.02 * jax.random.normal(ko, (dim, dim), dtype=jnp.float32)
    bo = jnp.zeros((1, dim), dtype=jnp.float32)
    gp = jnp.ones((1, dim), dtype=jnp.float32)
    bp = jnp.zeros((1, dim), dtype=jnp.float32)
    gq = jnp.ones((1, dim), dtype=jnp.float32)
    bq = jnp.zeros((1, dim), dtype=jnp.float32)
    gk = jnp.ones((1, dim), dtype=jnp.float32)
    bk = jnp.zeros((1, dim), dtype=jnp.float32)

    params = (wq, wk, wv, wo, bo, gp, bp, gq, bq, gk, bk)

    ref = mhsa_reference(x, params, heads)

    # f32 compute path: tight structural correctness check.
    out_f32 = jax.block_until_ready(
        mhsa_forward(x, params, heads, compute_dtype=jnp.float32))
    assert out_f32.shape == (B, N, dim)
    assert jnp.allclose(out_f32, ref, atol=2e-3, rtol=2e-3), (
        f"f32 max abs err {jnp.max(jnp.abs(out_f32 - ref))}")

    # bf16 MXU path (recommended config): f32 accumulation, looser tolerance.
    out_bf16 = jax.block_until_ready(
        mhsa_forward(x, params, heads, compute_dtype=jnp.bfloat16))
    assert jnp.allclose(out_bf16, ref, atol=3e-2, rtol=3e-2), (
        f"bf16 max abs err {jnp.max(jnp.abs(out_bf16 - ref))}")

    # Multi-tile flash path: grid = (B, 2 q-tiles, 2 kv-tiles) with online softmax.
    N2 = 16
    x2 = jax.random.normal(jax.random.PRNGKey(1), (B, N2, dim), dtype=jnp.float32)
    ref2 = mhsa_reference(x2, params, heads)
    out2 = jax.block_until_ready(
        mhsa_forward(x2, params, heads, q_tile=8, kv_tile=8,
                     compute_dtype=jnp.float32))
    assert jnp.allclose(out2, ref2, atol=2e-3, rtol=2e-3), (
        f"tiled max abs err {jnp.max(jnp.abs(out2 - ref2))}")

    # Padded + masked path: N=12 padded to 16, padded K/V positions masked.
    N3 = 12
    x3 = jax.random.normal(jax.random.PRNGKey(2), (B, N3, dim), dtype=jnp.float32)
    ref3 = mhsa_reference(x3, params, heads)
    out3 = jax.block_until_ready(
        mhsa_forward(x3, params, heads, q_tile=8, kv_tile=8,
                     compute_dtype=jnp.float32))
    assert out3.shape == (B, N3, dim)
    assert jnp.allclose(out3, ref3, atol=2e-3, rtol=2e-3), (
        f"padded max abs err {jnp.max(jnp.abs(out3 - ref3))}")

    print("KERNEL_OK")
</pallas_src>

<mosaic_0001>
module attributes {stable_mosaic.version = 11 : i64} {
  func.func @qkv_proj_kernel(%arg0: i32, %arg1: i32, %arg2: memref<1x8x32xf32, #tpu.memory_space<vmem>>, %arg3: memref<32x32xf32, #tpu.memory_space<vmem>>, %arg4: memref<32x32xf32, #tpu.memory_space<vmem>>, %arg5: memref<32x32xf32, #tpu.memory_space<vmem>>, %arg6: memref<1x32xf32, #tpu.memory_space<vmem>>, %arg7: memref<1x32xf32, #tpu.memory_space<vmem>>, %arg8: memref<1x32xf32, #tpu.memory_space<vmem>>, %arg9: memref<1x32xf32, #tpu.memory_space<vmem>>, %arg10: memref<1x32xf32, #tpu.memory_space<vmem>>, %arg11: memref<1x32xf32, #tpu.memory_space<vmem>>, %arg12: memref<1x8x32xf32, #tpu.memory_space<vmem>>, %arg13: memref<1x8x32xf32, #tpu.memory_space<vmem>>, %arg14: memref<1x8x32xf32, #tpu.memory_space<vmem>>) attributes {dimension_semantics = [#tpu.dimension_semantics<parallel>, #tpu.dimension_semantics<parallel>], iteration_bounds = array<i64: 2, 1>, scalar_prefetch = 0 : i64, scratch_operands = 0 : i64, tpu.core_type = #tpu.core_type<tc>, window_params = [{transform_indices = @transform_0, window_bounds = array<i64: 1, 8, 32>}, {pipeline_mode = #tpu.pipeline_mode<synchronous>, transform_indices = @transform_1, window_bounds = array<i64: 32, 32>}, {pipeline_mode = #tpu.pipeline_mode<synchronous>, transform_indices = @transform_2, window_bounds = array<i64: 32, 32>}, {pipeline_mode = #tpu.pipeline_mode<synchronous>, transform_indices = @transform_3, window_bounds = array<i64: 32, 32>}, {pipeline_mode = #tpu.pipeline_mode<synchronous>, transform_indices = @transform_4, window_bounds = array<i64: 1, 32>}, {pipeline_mode = #tpu.pipeline_mode<synchronous>, transform_indices = @transform_5, window_bounds = array<i64: 1, 32>}, {pipeline_mode = #tpu.pipeline_mode<synchronous>, transform_indices = @transform_6, window_bounds = array<i64: 1, 32>}, {pipeline_mode = #tpu.pipeline_mode<synchronous>, transform_indices = @transform_7, window_bounds = array<i64: 1, 32>}, {pipeline_mode = #tpu.pipeline_mode<synchronous>, transform_indices = @transform_8, window_bounds = array<i64: 1, 32>}, {pipeline_mode = #tpu.pipeline_mode<synchronous>, transform_indices = @transform_9, window_bounds = array<i64: 1, 32>}, {transform_indices = @transform_10, window_bounds = array<i64: 1, 8, 32>}, {transform_indices = @transform_11, window_bounds = array<i64: 1, 8, 32>}, {transform_indices = @transform_12, window_bounds = array<i64: 1, 8, 32>}]} {
    %c0 = arith.constant 0 : index
    %c0_0 = arith.constant 0 : index
    %c0_1 = arith.constant 0 : index
    %0 = vector.load %arg2[%c0, %c0_0, %c0_1] : memref<1x8x32xf32, #tpu.memory_space<vmem>>, vector<1x8x32xf32>
    %1 = vector.shape_cast %0 : vector<1x8x32xf32> to vector<8x32xf32>
    %c0_2 = arith.constant 0 : index
    %c0_3 = arith.constant 0 : index
    %2 = vector.load %arg6[%c0_2, %c0_3] : memref<1x32xf32, #tpu.memory_space<vmem>>, vector<1x32xf32>
    %c0_4 = arith.constant 0 : index
    %c0_5 = arith.constant 0 : index
    %3 = vector.load %arg7[%c0_4, %c0_5] : memref<1x32xf32, #tpu.memory_space<vmem>>, vector<1x32xf32>
    %cst = arith.constant dense<0.000000e+00> : vector<8xf32>
    %4 = vector.multi_reduction <add>, %1, %cst [1] : vector<8x32xf32> to vector<8xf32>
    %5 = vector.shape_cast %4 : vector<8xf32> to vector<8x1xf32>
    %cst_6 = arith.constant 3.200000e+01 : f32
    %6 = vector.broadcast %cst_6 : f32 to vector<8x1xf32>
    %7 = arith.divf %5, %6 : vector<8x1xf32>
    %8 = vector.broadcast %7 : vector<8x1xf32> to vector<8x32xf32>
    %9 = arith.subf %1, %8 : vector<8x32xf32>
    %10 = arith.mulf %9, %9 : vector<8x32xf32>
    %cst_7 = arith.constant dense<0.000000e+00> : vector<8xf32>
    %11 = vector.multi_reduction <add>, %10, %cst_7 [1] : vector<8x32xf32> to vector<8xf32>
    %12 = vector.shape_cast %11 : vector<8xf32> to vector<8x1xf32>
    %cst_8 = arith.constant 3.200000e+01 : f32
    %13 = vector.broadcast %cst_8 : f32 to vector<8x1xf32>
    %14 = arith.divf %12, %13 : vector<8x1xf32>
    %cst_9 = arith.constant 9.99999974E-6 : f32
    %15 = vector.broadcast %cst_9 : f32 to vector<8x1xf32>
    %16 = arith.addf %14, %15 : vector<8x1xf32>
    %17 = math.rsqrt %16 : vector<8x1xf32>
    %18 = vector.broadcast %17 : vector<8x1xf32> to vector<8x32xf32>
    %19 = arith.mulf %9, %18 : vector<8x32xf32>
    %20 = vector.broadcast %2 : vector<1x32xf32> to vector<8x32xf32>
    %21 = arith.mulf %19, %20 : vector<8x32xf32>
    %22 = vector.broadcast %3 : vector<1x32xf32> to vector<8x32xf32>
    %23 = arith.addf %21, %22 : vector<8x32xf32>
    %c0_10 = arith.constant 0 : index
    %c0_11 = arith.constant 0 : index
    %24 = vector.load %arg3[%c0_10, %c0_11] : memref<32x32xf32, #tpu.memory_space<vmem>>, vector<32x32xf32>
    %cst_12 = arith.constant dense<0.000000e+00> : vector<8x32xf32>
    %25 = tpu.matmul %23, %24, %cst_12 {dimension_numbers = #tpu.dot_dimension_numbers<[1], [0], [0], [1], [0, 0, 1, 1], [], []>} : vector<8x32xf32>, vector<32x32xf32>, vector<8x32xf32> -> vector<8x32xf32>
    %c0_13 = arith.constant 0 : index
    %c0_14 = arith.constant 0 : index
    %26 = vector.load %arg4[%c0_13, %c0_14] : memref<32x32xf32, #tpu.memory_space<vmem>>, vector<32x32xf32>
    %cst_15 = arith.constant dense<0.000000e+00> : vector<8x32xf32>
    %27 = tpu.matmul %23, %26, %cst_15 {dimension_numbers = #tpu.dot_dimension_numbers<[1], [0], [0], [1], [0, 0, 1, 1], [], []>} : vector<8x32xf32>, vector<32x32xf32>, vector<8x32xf32> -> vector<8x32xf32>
    %c0_16 = arith.constant 0 : index
    %c0_17 = arith.constant 0 : index
    %28 = vector.load %arg5[%c0_16, %c0_17] : memref<32x32xf32, #tpu.memory_space<vmem>>, vector<32x32xf32>
    %cst_18 = arith.constant dense<0.000000e+00> : vector<8x32xf32>
    %29 = tpu.matmul %23, %28, %cst_18 {dimension_numbers = #tpu.dot_dimension_numbers<[1], [0], [0], [1], [0, 0, 1, 1], [], []>} : vector<8x32xf32>, vector<32x32xf32>, vector<8x32xf32> -> vector<8x32xf32>
    %c0_19 = arith.constant 0 : index
    %c0_20 = arith.constant 0 : index
    %30 = vector.load %arg8[%c0_19, %c0_20] : memref<1x32xf32, #tpu.memory_space<vmem>>, vector<1x32xf32>
    %c0_21 = arith.constant 0 : index
    %c0_22 = arith.constant 0 : index
    %31 = vector.load %arg9[%c0_21, %c0_22] : memref<1x32xf32, #tpu.memory_space<vmem>>, vector<1x32xf32>
    %cst_23 = arith.constant dense<0.000000e+00> : vector<8xf32>
    %32 = vector.multi_reduction <add>, %25, %cst_23 [1] : vector<8x32xf32> to vector<8xf32>
    %33 = vector.shape_cast %32 : vector<8xf32> to vector<8x1xf32>
    %cst_24 = arith.constant 3.200000e+01 : f32
    %34 = vector.broadcast %cst_24 : f32 to vector<8x1xf32>
    %35 = arith.divf %33, %34 : vector<8x1xf32>
    %36 = vector.broadcast %35 : vector<8x1xf32> to vector<8x32xf32>
    %37 = arith.subf %25, %36 : vector<8x32xf32>
    %38 = arith.mulf %37, %37 : vector<8x32xf32>
    %cst_25 = arith.constant dense<0.000000e+00> : vector<8xf32>
    %39 = vector.multi_reduction <add>, %38, %cst_25 [1] : vector<8x32xf32> to vector<8xf32>
    %40 = vector.shape_cast %39 : vector<8xf32> to vector<8x1xf32>
    %cst_26 = arith.constant 3.200000e+01 : f32
    %41 = vector.broadcast %cst_26 : f32 to vector<8x1xf32>
    %42 = arith.divf %40, %41 : vector<8x1xf32>
    %cst_27 = arith.constant 9.99999974E-6 : f32
    %43 = vector.broadcast %cst_27 : f32 to vector<8x1xf32>
    %44 = arith.addf %42, %43 : vector<8x1xf32>
    %45 = math.rsqrt %44 : vector<8x1xf32>
    %46 = vector.broadcast %45 : vector<8x1xf32> to vector<8x32xf32>
    %47 = arith.mulf %37, %46 : vector<8x32xf32>
    %48 = vector.broadcast %30 : vector<1x32xf32> to vector<8x32xf32>
    %49 = arith.mulf %47, %48 : vector<8x32xf32>
    %50 = vector.broadcast %31 : vector<1x32xf32> to vector<8x32xf32>
    %51 = arith.addf %49, %50 : vector<8x32xf32>
    %cst_28 = arith.constant 0.176776692 : f32
    %52 = vector.broadcast %cst_28 : f32 to vector<8x32xf32>
    %53 = arith.mulf %51, %52 : vector<8x32xf32>
    %c0_29 = arith.constant 0 : index
    %c0_30 = arith.constant 0 : index
    %54 = vector.load %arg10[%c0_29, %c0_30] : memref<1x32xf32, #tpu.memory_space<vmem>>, vector<1x32xf32>
    %c0_31 = arith.constant 0 : index
    %c0_32 = arith.constant 0 : index
    %55 = vector.load %arg11[%c0_31, %c0_32] : memref<1x32xf32, #tpu.memory_space<vmem>>, vector<1x32xf32>
    %cst_33 = arith.constant dense<0.000000e+00> : vector<8xf32>
    %56 = vector.multi_reduction <add>, %27, %cst_33 [1] : vector<8x32xf32> to vector<8xf32>
    %57 = vector.shape_cast %56 : vector<8xf32> to vector<8x1xf32>
    %cst_34 = arith.constant 3.200000e+01 : f32
    %58 = vector.broadcast %cst_34 : f32 to vector<8x1xf32>
    %59 = arith.divf %57, %58 : vector<8x1xf32>
    %60 = vector.broadcast %59 : vector<8x1xf32> to vector<8x32xf32>
    %61 = arith.subf %27, %60 : vector<8x32xf32>
    %62 = arith.mulf %61, %61 : vector<8x32xf32>
    %cst_35 = arith.constant dense<0.000000e+00> : vector<8xf32>
    %63 = vector.multi_reduction <add>, %62, %cst_35 [1] : vector<8x32xf32> to vector<8xf32>
    %64 = vector.shape_cast %63 : vector<8xf32> to vector<8x1xf32>
    %cst_36 = arith.constant 3.200000e+01 : f32
    %65 = vector.broadcast %cst_36 : f32 to vector<8x1xf32>
    %66 = arith.divf %64, %65 : vector<8x1xf32>
    %cst_37 = arith.constant 9.99999974E-6 : f32
    %67 = vector.broadcast %cst_37 : f32 to vector<8x1xf32>
    %68 = arith.addf %66, %67 : vector<8x1xf32>
    %69 = math.rsqrt %68 : vector<8x1xf32>
    %70 = vector.broadcast %69 : vector<8x1xf32> to vector<8x32xf32>
    %71 = arith.mulf %61, %70 : vector<8x32xf32>
    %72 = vector.broadcast %54 : vector<1x32xf32> to vector<8x32xf32>
    %73 = arith.mulf %71, %72 : vector<8x32xf32>
    %74 = vector.broadcast %55 : vector<1x32xf32> to vector<8x32xf32>
    %75 = arith.addf %73, %74 : vector<8x32xf32>
    %c0_38 = arith.constant 0 : index
    %c0_39 = arith.constant 0 : index
    %c0_40 = arith.constant 0 : index
    %76 = vector.load %arg12[%c0_38, %c0_39, %c0_40] : memref<1x8x32xf32, #tpu.memory_space<vmem>>, vector<1x8x32xf32>
    %77 = vector.shape_cast %76 : vector<1x8x32xf32> to vector<8x32xf32>
    %78 = vector.shape_cast %53 : vector<8x32xf32> to vector<1x8x32xf32>
    tpu.vector_store %arg12[%c0_38, %c0_39, %c0_40], %78 {strides = array<i32>} : memref<1x8x32xf32, #tpu.memory_space<vmem>>, vector<1x8x32xf32>,
    %c0_41 = arith.constant 0 : index
    %c0_42 = arith.constant 0 : index
    %c0_43 = arith.constant 0 : index
    %79 = vector.load %arg13[%c0_41, %c0_42, %c0_43] : memref<1x8x32xf32, #tpu.memory_space<vmem>>, vector<1x8x32xf32>
    %80 = vector.shape_cast %79 : vector<1x8x32xf32> to vector<8x32xf32>
    %81 = vector.shape_cast %75 : vector<8x32xf32> to vector<1x8x32xf32>
    tpu.vector_store %arg13[%c0_41, %c0_42, %c0_43], %81 {strides = array<i32>} : memref<1x8x32xf32, #tpu.memory_space<vmem>>, vector<1x8x32xf32>,
    %c0_44 = arith.constant 0 : index
    %c0_45 = arith.constant 0 : index
    %c0_46 = arith.constant 0 : index
    %82 = vector.load %arg14[%c0_44, %c0_45, %c0_46] : memref<1x8x32xf32, #tpu.memory_space<vmem>>, vector<1x8x32xf32>
    %83 = vector.shape_cast %82 : vector<1x8x32xf32> to vector<8x32xf32>
    %84 = vector.shape_cast %29 : vector<8x32xf32> to vector<1x8x32xf32>
    tpu.vector_store %arg14[%c0_44, %c0_45, %c0_46], %84 {strides = array<i32>} : memref<1x8x32xf32, #tpu.memory_space<vmem>>, vector<1x8x32xf32>,
    return
  }
  func.func @transform_0(%arg0: i32, %arg1: i32) -> (i32, i32, i32) {
    %c0_i32 = arith.constant 0 : i32
    %c0_i32_0 = arith.constant 0 : i32
    return %arg0, %arg1, %c0_i32 : i32, i32, i32
  }
  func.func @transform_1(%arg0: i32, %arg1: i32) -> (i32, i32) {
    %c0_i32 = arith.constant 0 : i32
    %c0_i32_0 = arith.constant 0 : i32
    %c0_i32_1 = arith.constant 0 : i32
    return %c0_i32, %c0_i32_0 : i32, i32
  }
  func.func @transform_2(%arg0: i32, %arg1: i32) -> (i32, i32) {
    %c0_i32 = arith.constant 0 : i32
    %c0_i32_0 = arith.constant 0 : i32
    %c0_i32_1 = arith.constant 0 : i32
    return %c0_i32, %c0_i32_0 : i32, i32
  }
  func.func @transform_3(%arg0: i32, %arg1: i32) -> (i32, i32) {
    %c0_i32 = arith.constant 0 : i32
    %c0_i32_0 = arith.constant 0 : i32
    %c0_i32_1 = arith.constant 0 : i32
    return %c0_i32, %c0_i32_0 : i32, i32
  }
  func.func @transform_4(%arg0: i32, %arg1: i32) -> (i32, i32) {
    %c0_i32 = arith.constant 0 : i32
    %c0_i32_0 = arith.constant 0 : i32
    %c0_i32_1 = arith.constant 0 : i32
    return %c0_i32, %c0_i32_0 : i32, i32
  }
  func.func @transform_5(%arg0: i32, %arg1: i32) -> (i32, i32) {
    %c0_i32 = arith.constant 0 : i32
    %c0_i32_0 = arith.constant 0 : i32
    %c0_i32_1 = arith.constant 0 : i32
    return %c0_i32, %c0_i32_0 : i32, i32
  }
  func.func @transform_6(%arg0: i32, %arg1: i32) -> (i32, i32) {
    %c0_i32 = arith.constant 0 : i32
    %c0_i32_0 = arith.constant 0 : i32
    %c0_i32_1 = arith.constant 0 : i32
    return %c0_i32, %c0_i32_0 : i32, i32
  }
  func.func @transform_7(%arg0: i32, %arg1: i32) -> (i32, i32) {
    %c0_i32 = arith.constant 0 : i32
    %c0_i32_0 = arith.constant 0 : i32
    %c0_i32_1 = arith.constant 0 : i32
    return %c0_i32, %c0_i32_0 : i32, i32
  }
  func.func @transform_8(%arg0: i32, %arg1: i32) -> (i32, i32) {
    %c0_i32 = arith.constant 0 : i32
    %c0_i32_0 = arith.constant 0 : i32
    %c0_i32_1 = arith.constant 0 : i32
    return %c0_i32, %c0_i32_0 : i32, i32
  }
  func.func @transform_9(%arg0: i32, %arg1: i32) -> (i32, i32) {
    %c0_i32 = arith.constant 0 : i32
    %c0_i32_0 = arith.constant 0 : i32
    %c0_i32_1 = arith.constant 0 : i32
    return %c0_i32, %c0_i32_0 : i32, i32
  }
  func.func @transform_10(%arg0: i32, %arg1: i32) -> (i32, i32, i32) {
    %c0_i32 = arith.constant 0 : i32
    %c0_i32_0 = arith.constant 0 : i32
    return %arg0, %arg1, %c0_i32 : i32, i32, i32
  }
  func.func @transform_11(%arg0: i32, %arg1: i32) -> (i32, i32, i32) {
    %c0_i32 = arith.constant 0 : i32
    %c0_i32_0 = arith.constant 0 : i32
    return %arg0, %arg1, %c0_i32 : i32, i32, i32
  }
  func.func @transform_12(%arg0: i32, %arg1: i32) -> (i32, i32, i32) {
    %c0_i32 = arith.constant 0 : i32
    %c0_i32_0 = arith.constant 0 : i32
    return %arg0, %arg1, %c0_i32 : i32, i32, i32
  }
}

</mosaic_0001>

<bundles_post_ra>
// kernel: tpu_custom_call.1
= control target key start
LH: loop header
LB: loop body
LE: loop exit
PB: predicated region body
PF: predicated region fallthrough
CT: control target
= control target key end

     0   :  { %s1885_s0 = inlined_call_operand.hbm [shape: f32[2,8,32], index: 0, kind: input, shape index: {}]   ;;  %s1886_s1 = inlined_call_operand.hbm [shape: f32[32,32], index: 1, kind: input, shape index: {}]   ;;  %s1887_s2 = inlined_call_operand.hbm [shape: f32[32,32], index: 2, kind: input, shape index: {}]   ;;  %s1888_s3 = inlined_call_operand.hbm [shape: f32[32,32], index: 3, kind: input, shape index: {}]   ;;  %s1889_s4 = inlined_call_operand.vmem [shape: f32[1,32], index: 4, kind: input, shape index: {}]   ;;  %s1890_s5 = inlined_call_operand.vmem [shape: f32[1,32], index: 5, kind: input, shape index: {}]   ;;  %s1891_s6 = inlined_call_operand.vmem [shape: f32[1,32], index: 6, kind: input, shape index: {}]   ;;  %s1892_s7 = inlined_call_operand.vmem [shape: f32[1,32], index: 7, kind: input, shape index: {}]   ;;  %s1893_s8 = inlined_call_operand.vmem [shape: f32[1,32], index: 8, kind: input, shape index: {}]   ;;  %s1894_s9 = inlined_call_operand.vmem [shape: f32[1,32], index: 9, kind: input, shape index: {}]   ;;  %s1895_s10 = inlined_call_operand.hbm [shape: f32[2,8,32], index: 10, kind: output, shape index: {0}]   ;;  %s1896_s11 = inlined_call_operand.hbm [shape: f32[2,8,32], index: 11, kind: output, shape index: {1}]   ;;  %s1897_s12 = inlined_call_operand.hbm [shape: f32[2,8,32], index: 12, kind: output, shape index: {2}]  }
   0x1   :  { %1907 = sst [smem:[#allocation22_spill]] %s1885_s0 }
   0x2   :  { %1908 = sst [smem:[#allocation23_spill]] %s1886_s1 }
   0x3   :  { %1909 = sst [smem:[#allocation24_spill]] %s1887_s2 }
   0x4   :  { %1910 = sst [smem:[#allocation25_spill]] %s1888_s3 }
   0x5   :  { %1911 = sst [smem:[#allocation26_spill]] %s1889_s4 }
   0x6   :  { %1912 = sst [smem:[#allocation27_spill]] %s1890_s5 }
   0x7   :  { %1913 = sst [smem:[#allocation28_spill]] %s1896_s11 }
   0x8   :  { %1914 = sst [smem:[#allocation29_spill]] %s1897_s12 }
   0x9   :  { %18 = vsyncpa [#allocation3], 0 }
   0xa   :  { %20 = vsyncpa [#allocation3 + $0x1], 0 }
   0xb   :  { %21 = vsyncpa [#allocation6], 0 }
   0xc   :  { %22 = vsyncpa [#allocation9], 0 }
   0xd   :  { %23 = vsyncpa [#allocation4], 0 }
   0xe   :  { %25 = vsyncpa [#allocation4 + $0x1], 0 }
   0xf   :  { %26 = vsyncpa [#allocation12], 0 }
  0x10   :  { %28 = vsyncpa [#allocation12 + $0x1], 0  ;;  %s1579_s21 = smov 0   ;;  %s1581_s22 = smov 0  }
  0x11   :  { %s1583_s23 = smov 0   ;;  %s1585_s24 = smov 0  }
  0x12   :  { %s1587_s25 = smov 0   ;;  %s1589_s26 = smov 0  }
  0x13 LB: > { %1915 = sst [smem:[#allocation19_spill]] %s1481_s21  ;;  %s1610_s27 = sadd.s32 4294967295, %s1501_s26   ;;  %s1501_s26 = sphi %s1589_s26, %s34_s26   ;;  %s1497_s25 = sphi %s1587_s25, %s1950_s25   ;;  %s1493_s24 = sphi %s1585_s24, %s1949_s24   ;;  %s1489_s23 = sphi %s1583_s23, %s1948_s23   ;;  %s1485_s22 = sphi %s1581_s22, %s1947_s22   ;;  %s1481_s21 = sphi %s1579_s21, %s1946_s21  }
  0x14   : > { %s1898_s28 = sadd.s32 4294967294, %s1501_s26   ;;  %p68_p0 = scmp.ne.s32.totalorder %s1485_s22, %s1481_s21 }
  0x15   : > { %p1901_p1 = scmp.eq.s32.totalorder %s1610_s27, 0  ;;  %p289_p3 = scmp.eq.s32.totalorder %s1898_s28, 1 }
  0x16   : > { %p1058_p5 = scmp.ge.s32.totalorder %s1501_s26, 1  ;;  %p352_p7 = scmp.lt.s32.totalorder %s1501_s26, 3 }
  0x17   : > { %p1621_p4 = por %p1901_p1, %p68_p0  ;;  %p1626_p6 = por %p289_p3, %p68_p0 }
  0x18   : > { %p1631_p8 = pnand %p1058_p5, %p352_p7  ;;  %s1503_s14 = smov [#allocation5]  }
  0x19   : > { %s1916_s29 = scalar_select %p1621_p4, 1, 0 }
  0x1a   : > { %s1917_s30 = scalar_select %p1626_p6, 1, 0 }
  0x1b   : > { %s364_s15 = sshll.u32 %s1503_s14, 4  ;;  %p1158_p9 = pneg %p1631_p8  ;;  %s365_s15 = int_to_ptr.vmem [resolvable:$true] %s364_s15 }
  0x1c   : > { %1918 = sst [smem:[#allocation20_spill]] %s1917_s30  ;;  %s1504_s17 = smov [#allocation7]  }
  0x1d   : > { %p1640_p11 = pnand %p1158_p9, %p1901_p1  ;;  %s377_s18 = sshll.u32 %s1504_s17, 4  ;;  %s378_s18 = int_to_ptr.vmem [resolvable:$true] %s377_s18 }
  0x1e   : > { %s1505_s19 = smov [#allocation8]   ;;  %s1262_s28 = scalar_lea.vmem %s365_s15, 512 }
  0x1f   : > { %s390_s20 = sshll.u32 %s1505_s19, 4  ;;  %p1253_p12 = pneg %p1640_p11  ;;  %s391_s20 = int_to_ptr.vmem [resolvable:$true] %s390_s20 }
  0x20   : > { %p1263_p13 = scmp.ne.s32.totalorder %s365_s15, %s1262_s28  ;;  %p1270_p5 = scmp.lt.s32.totalorder %s365_s15, %s365_s15 }
  0x21   : > { %p1271_p7 = scmp.lt.s32.totalorder %s1262_s28, %s1262_s28 }
  0x22   : > { %p1265_p0 = pnand %p1263_p13, %p1253_p12 }
  0x23   : > { %p1272_p9 = por %p1271_p7, %p1270_p5 }
  0x24   : > { %p1266_p3 = pneg %p1265_p0 }
  0x26   : > { %p1273_p10 = pnand %p1272_p9, %p1266_p3 }
  0x28   : > { %1276 = shalt.err (!%p1273_p10)
}
  0x29   : > { %s1506_s14 = smov 128   ;;  %s1507_s17 = smov 8  }
  0x2a   : > { %s1921_s1 = sld [smem:[#allocation23_spill]]  ;;  %s1288_s21 = scalar_lea.vmem %s378_s18, 512 }
  0x2b   : > { %p1289_p1 = scmp.ne.s32.totalorder %s378_s18, %s1288_s21  ;;  %p1296_p2 = scmp.lt.s32.totalorder %s378_s18, %s378_s18 }
  0x2c   : > { %p1297_p6 = scmp.lt.s32.totalorder %s1288_s21, %s1288_s21 }
  0x2d   : > { %p1291_p13 = pnand %p1289_p1, %p1253_p12 }
  0x2e   : > { %p1298_p5 = por %p1297_p6, %p1296_p2 }
  0x2f   : > { %p1292_p0 = pneg %p1291_p13 }
  0x30   : > { %1161 = dma.hbm_to_vmem [thread:$0]  (!%p1640_p11), %s1921_s1, 512, %s365_s15, [#allocation6], %s1506_s14, %s1506_s14, %s1507_s17  }
  0x31   : > { %p1299_p3 = pnand %p1298_p5, %p1292_p0 }
  0x33   : > { %1302 = shalt.err (!%p1299_p3)
}
  0x34   : > { %s1922_s2 = sld [smem:[#allocation24_spill]]  ;;  %s1314_s30 = scalar_lea.vmem %s391_s20, 512 }
  0x35   : > { %p1315_p10 = scmp.ne.s32.totalorder %s391_s20, %s1314_s30  ;;  %p1322_p9 = scmp.lt.s32.totalorder %s391_s20, %s391_s20 }
  0x36   : > { %p1323_p13 = scmp.lt.s32.totalorder %s1314_s30, %s1314_s30 }
  0x37   : > { %p1317_p7 = pnand %p1315_p10, %p1253_p12 }
  0x38   : > { %p1324_p4 = por %p1323_p13, %p1322_p9 }
  0x39   : > { %p1318_p1 = pneg %p1317_p7 }
  0x3a   : > { %1164 = dma.hbm_to_vmem [thread:$0]  (!%p1640_p11), %s1922_s2, 512, %s378_s18, [#allocation6], %s1506_s14, %s1506_s14, %s1507_s17  }
  0x3b   : > { %p1325_p2 = pnand %p1324_p4, %p1318_p1 }
  0x3d   : > { %1328 = shalt.err (!%p1325_p2)
}
  0x3e   : > { %s1923_s3 = sld [smem:[#allocation25_spill]]  ;;  %s55_s12 = sadd.s32 1, %s1489_s23 }
  0x3f   : > { %s46_s18 = sadd.s32 1, %s1497_s25  ;;  %p62_p4 = scmp.ne.s32.totalorder %s1489_s23, %s1485_s22 }
  0x40   : > { %p48_p6 = scmp.ge.s32.totalorder %s46_s18, 2  ;;  %p63_p12 = scmp.eq.s32.totalorder %s1501_s26, 0 }
  0x41   : > { %p1924_p0 = scmp.eq.s32.totalorder %s1610_s27, 1  ;;  %p1185_p3 = scmp.lt.s32.totalorder %s1501_s26, 2 }
  0x42   : > { %s1952_s18 = smov (%p48_p6, %s46_s18), 0  ;;  %p64_p10 = por %p63_p12, %p62_p4 }
  0x43   : > { %p1677_p5 = por %p1924_p0, %p62_p4  ;;  %1926 = sst [smem:[#allocation21_spill]] %s1952_s18 }
  0x44   : > { %1167 = dma.hbm_to_vmem [thread:$0]  (!%p1640_p11), %s1923_s3, 512, %s391_s20, [#allocation9], %s1506_s14, %s1506_s14, %s1507_s17  }
  0x45   : > { %s422_s19 = sand.u32 1, %s1489_s23   ;;  %s50_s28 = ssub.s32 %s1497_s25, %s1952_s18 }
  0x46   : > { %p53_p7 = scmp.eq.s32.totalorder %s50_s28, 0  ;;  %s1063_s20 = sshll.u32 %s422_s19, 3 }
  0x47   : > { %s1064_s14 = sshll.u32 %s1497_s25, 7  ;;  %s1927_s0 = sld [smem:[#allocation22_spill]] }
  0x48   : > { %s1689_s17 = scalar_select %p53_p7, %s1489_s23, %s55_s12  }
  0x49   : > { %s426_s1 = scalar_lea.vmem [#allocation2], %s1063_s20  ;;  %p1696_p11 = pnand %p1185_p3, %p64_p10 }
  0x4a   : > { %s434_s2 = sshll.u32 %s426_s1, 4  ;;  %s423_s11 = scalar_lea.sflag [#allocation3], %s422_s19  ;;  %s435_s2 = int_to_ptr.vmem [resolvable:$true] %s434_s2 }
  0x4b   : > { %p1331_p1 = pneg %p1696_p11  ;;  %s1342_s28 = scalar_lea.vmem %s435_s2, 128 }
  0x4c   : > { %p1343_p9 = scmp.ne.s32.totalorder %s435_s2, %s1342_s28  ;;  %s1508_s12 = smov [#allocation2]  }
  0x4d   : > { %s432_s15 = scalar_lea.hbm %s1927_s0, %s1064_s14  ;;  %s1347_s18 = sshll.u32 %s1508_s12, 4  ;;  %s1348_s18 = int_to_ptr.vmem [resolvable:$false] %s1347_s18 }
  0x4e   : > { %p1345_p13 = pnand %p1343_p9, %p1331_p1  ;;  %s1349_s14 = scalar_lea.vmem %s1348_s18, 256 }
  0x4f   : > { %p1350_p4 = scmp.lt.s32.totalorder %s435_s2, %s1348_s18  ;;  %p1351_p6 = scmp.lt.s32.totalorder %s1349_s14, %s1342_s28 }
  0x50   : > { %p1346_p2 = pneg %p1345_p13 }
  0x51   : > { %p1352_p12 = por %p1351_p6, %p1350_p4 }
  0x53   : > { %p1353_p0 = pnand %p1352_p12, %p1346_p2 }
  0x55   : > { %1356 = shalt.err (!%p1353_p0)
}
  0x56   : > { %1171 = dma.hbm_to_vmem [thread:$0]  (!%p1696_p11), %s432_s15, 128, %s435_s2, %s423_s11  }
  0x57   : > { %443 = sbr.rel (%p1631_p8) target bundleno = 969 (0x3c9), region = 60  ;;  %s1707_s1 = sand.u32 (!%p1631_p8), 1, %s1485_s22  }
  0x58   : > { %s1710_s19 = sshll.u32 (!%p1631_p8), %s1707_s1, 3  ;;  %s446_s18 = scalar_lea.sflag (!%p1631_p8), [#allocation3], %s1707_s1 }
  0x59   : > { %s449_s20 = scalar_lea.vmem (!%p1631_p8), [#allocation2], %s1710_s19  ;;  %p1929_p3 = scmp.ne.s32.totalorder (!%p1631_p8), %s1916_s29, 0 }
  0x5c   : > { %1460 = dma.done.wait (%p1929_p3), %s446_s18, 128  }
  0x5d   : > { %1462 = vsyncadd (%p1929_p3), %s446_s18, 4294967168  ;;  %p1930_p10 = scmp.eq.s32.totalorder %s1610_s27, 0 }
  0x5f   : > { %1464 = dma.done.wait (%p1930_p10), [#allocation6], 1024   ;;  %p1931_p8 = pmov %p1930_p10 }
  0x61   : > { %1466 = vsyncadd (%p1931_p8), [#allocation6], 4294966272  ;;  %p1932_p7 = pmov %p1931_p8 }
  0x63   : > { %1468 = dma.done.wait (%p1932_p7), [#allocation9], 512   ;;  %p1933_p11 = pmov %p1932_p7 }
  0x64   : > { %vm515_vm0 = vcmask 261120   ;;  %v512_v0 = vld [vmem:[%s449_s20] sm:$0xff]  ;;  %v1509_v9 = vmov 0.0   ;;  %v545_v12 = vld [vmem:[#allocation5 + $0x8] sm:$0xff]  ;;  %v544_v14 = vld [vmem:[#allocation5] sm:$0xff]  ;;  %vm1510_vm1 = vmmov 0  }
  0x65   : > { %1470 = vsyncadd (%p1933_p11), [#allocation9], 4294966784  ;;  %v516_v1 = vsel %vm515_vm0, %v512_v0, 0.0  ;;  %v547_v7 = vld [vmem:[#allocation5 + $0x18] sm:$0xff]  ;;  %1105 = vmatprep.subr.mxu0 %v1509_v9  ;;  %1116 = vmatprep.subr.mxu1 %v1509_v9  ;;  %v546_v10 = vld [vmem:[#allocation5 + $0x10] sm:$0xff]  ;;  %s1934_s4 = sld [smem:[#allocation26_spill]] }
  0x66   : > { %517 = vadd.xlane.f32.xlu0 %v516_v1  ;;  %v624_v8 = vld [vmem:[#allocation7 + $0x18] sm:$0xff]  ;;  %v623_v11 = vld [vmem:[#allocation7 + $0x10] sm:$0xff]  ;;  %1106 = vmatpush3.msra.mxu0 %v547_v7  ;;  %v622_v13 = vld [vmem:[#allocation7 + $0x8] sm:$0xff]  ;;  %s1935_s5 = sld [smem:[#allocation27_spill]]  ;;  %s511_s13 = scalar_lea.vmem [#allocation13], %s1710_s19 }
  0x67   : > { %1117 = vmatpush3.msra.mxu1 %v624_v8  ;;  %1107 = vmatprep.subr.mxu0 %v1509_v9  ;;  %v621_v15 = vld [vmem:[#allocation7] sm:$0xff]  ;;  %v698_v25 = vld [vmem:[#allocation8 + $0x18] sm:$0xff]  ;;  %v697_v26 = vld [vmem:[#allocation8 + $0x10] sm:$0xff]  ;;  %s1085_s20 = sshll.u32 %s1493_s24, 7  ;;  %s497_s2 = scalar_lea.vmem [#allocation10], %s1710_s19 }
  0x68   : > { %1118 = vmatprep.subr.mxu1 %v1509_v9  ;;  %1108 = vmatpush3.msra.mxu0 %v546_v10  ;;  %v696_v27 = vld [vmem:[#allocation8 + $0x8] sm:$0xff]  ;;  %v695_v28 = vld [vmem:[#allocation8] sm:$0xff]  ;;  %v1078_v54 = vld [vmem:[%s1891_s6] ss:$0 sm:$0xff]  ;;  %s856_s3 = sshll.u32 %s497_s2, 4  ;;  %s884_s11 = sshll.u32 %s511_s13, 4  ;;  %s1773_s3 = int_to_ptr.vmem [resolvable:$true] %s856_s3  ;;  %s1788_s11 = int_to_ptr.vmem [resolvable:$true] %s884_s11 }
  0x69   : > { %1119 = vmatpush3.msra.mxu1 %v623_v11  ;;  %1109 = vmatprep.subr.mxu0 %v1509_v9  ;;  %v1079_v56 = vld [vmem:[%s1892_s7] ss:$0 sm:$0xff]  ;;  %s1906_s29 = scalar_lea.vmem [#allocation11], %s1710_s19  ;;  %s1771_s24 = scalar_lea.hbm %s1895_s10, %s1085_s20 }
  0x6a   : > { %1120 = vmatprep.subr.mxu1 %v1509_v9  ;;  %1110 = vmatpush3.msra.mxu0 %v545_v12  ;;  %v1080_v59 = vld [vmem:[%s1893_s8] ss:$0 sm:$0xff]  ;;  %s870_s30 = sshll.u32 %s1906_s29, 4  ;;  %s1936_s12 = sld [smem:[#allocation28_spill]]  ;;  %s1780_s30 = int_to_ptr.vmem [resolvable:$true] %s870_s30 }
  0x6b   : > { %1121 = vmatpush3.msra.mxu1 %v622_v13  ;;  %1111 = vmatprep.subr.mxu0 %v1509_v9  ;;  %v1073_v20 = vld [vmem:[%s1934_s4] ss:$0 sm:$0xff]  ;;  %s1937_s28 = sld [smem:[#allocation29_spill]]  ;;  %s832_s0 = scalar_lea.sflag [#allocation4], %s1707_s1 }
  0x6c   : > { %1122 = vmatprep.subr.mxu1 %v1509_v9  ;;  %1112 = vmatpush3.msra.mxu0 %v544_v14  ;;  %v1074_v22 = vld [vmem:[%s1935_s5] ss:$0 sm:$0xff]  ;;  %s1357_s4 = scalar_lea.vmem %s1773_s3, 128 }
  0x6d   : > { %1113 = vmatprep.mubr.msk.f32.mxu0 %vm1510_vm1, %v1509_v9  ;;  %1123 = vmatpush3.msra.mxu1 %v621_v15  ;;  %v1081_v62 = vld [vmem:[%s1894_s9] ss:$0 sm:$0xff]  ;;  %p1358_p1 = scmp.ne.s32.totalorder %s1773_s3, %s1357_s4 }
  0x6e   : > { %1124 = vmatprep.mubr.msk.f32.mxu1 %vm1510_vm1, %v1509_v9  ;;  %1127 = vmatprep.subr.mxu0 %v1509_v9 }
  0x6f   : > { %p1359_p9 = pnand %p1358_p1, %p1677_p5 }
  0x70   : > { %s1778_s29 = scalar_lea.hbm %s1936_s12, %s1085_s20 }
  0x71   : > { %s1786_s14 = scalar_lea.hbm %s1937_s28, %s1085_s20  ;;  %p1360_p13 = pneg %p1359_p9 }
  0xef   : > { %v518_v2 = vpop.xlane.xlu0 %517 }
  0xf0   : > { %v520_v3 = vmul.f32 0.03125, %v518_v2 }
  0xf2   : > { %v521_v4 = vsub.f32 %v512_v0, %v520_v3 }
  0xf4   : > { %v522_v5 = vmul.f32 %v521_v4, %v521_v4 }
  0xf6   : > { %v523_v6 = vsel %vm515_vm0, %v522_v5, 0.0 }
  0xf7   : > { %524 = vadd.xlane.f32.xlu0 %v523_v6 }
 0x180   : > { %v525_v16 = vpop.xlane.xlu0 %524 }
 0x181   : > { %v526_v17 = vmul.f32 0.03125, %v525_v16 }
 0x183   : > { %v527_v18 = vadd.f32 1e-05, %v526_v17 }
 0x185   : > { %1245 = vrsqrt.f32 %v527_v18 }
 0x192   : > { %v1246_v19 = vpop.eup %1245 }
 0x193   : > { %v529_v21 = vmul.f32 %v1246_v19, %v521_v4 }
 0x195   : > { %v536_v23 = vmul.f32 %v1073_v20, %v529_v21 }
 0x197   : > { %v543_v24 = vadd.f32 %v1074_v22, %v536_v23 }
 0x199   : > { %1114 = vmatmul.mubr.msk.f32.vlgmr.msra.gmra.mxu0 %vm515_vm0, %v543_v24  ;;  %1125 = vmatmul.mubr.msk.f32.vlgmr.msra.gmra.mxu1 %vm515_vm0, %v543_v24 }
 0x19a   : > { %1128 = vmatpush3.msra.mxu0 %v698_v25  ;;  %1135 = vmatprep.mubr.msk.f32.mxu0 %vm1510_vm1, %v1509_v9 }
 0x19b   : > { %1129 = vmatprep.subr.mxu0 %v1509_v9 }
 0x19c   : > { %1130 = vmatpush3.msra.mxu0 %v697_v26 }
 0x19d   : > { %1131 = vmatprep.subr.mxu0 %v1509_v9 }
 0x19e   : > { %1132 = vmatpush3.msra.mxu0 %v696_v27 }
 0x19f   : > { %1133 = vmatprep.subr.mxu0 %v1509_v9 }
 0x1a0   : > { %1134 = vmatpush3.msra.mxu0 %v695_v28 }
 0x1a1   : > { %1136 = vmatmul.mubr.msk.f32.vlgmr.msra.gmra.mxu0 %vm515_vm0, %v543_v24 }
 0x259   : > { %v617_v29 = vpop.f32.mrf.mxu0  ;;  %v691_v30 = vpop.f32.mrf.mxu1 }
 0x25a   : > { %v771_v31 = vsel %vm515_vm0, %v617_v29, 0.0  ;;  %v801_v34 = vsel %vm515_vm0, %v691_v30, 0.0 }
 0x25b   : > { %v1126_v32 = vpop.f32.mrf.mxu1  ;;  %772 = vadd.xlane.f32.xlu1 %v771_v31  ;;  %v1115_v33 = vpop.f32.mrf.mxu0 }
 0x25f   : > { %802 = vadd.xlane.f32.xlu1 %v801_v34 }
 0x261   : > { %v765_v35 = vpop.f32.mrf.mxu0 }
 0x262   : > { %830 = vst.msk [vmem:[%s511_s13] sm:$0xff] %vm515_vm0, %v765_v35  ;;  %s1511_s13 = smov [#allocation10]  }
 0x263   : > { %v1137_v36 = vpop.f32.mrf.mxu0  ;;  %s1361_s18 = sshll.u32 %s1511_s13, 4  ;;  %s1362_s18 = int_to_ptr.vmem [resolvable:$false] %s1361_s18 }
 0x264   : > { %s1363_s5 = scalar_lea.vmem %s1362_s18, 256  ;;  %p1364_p2 = scmp.lt.s32.totalorder %s1773_s3, %s1362_s18 }
 0x265   : > { %p1365_p4 = scmp.lt.s32.totalorder %s1363_s5, %s1357_s4 }
 0x267   : > { %p1366_p6 = por %p1365_p4, %p1364_p2 }
 0x269   : > { %p1367_p12 = pnand %p1366_p6, %p1360_p13 }
 0x2e4   : > { %v773_v37 = vpop.xlane.xlu1 %772 }
 0x2e5   : > { %v774_v38 = vmul.f32 0.03125, %v773_v37 }
 0x2e7   : > { %v775_v39 = vsub.f32 %v617_v29, %v774_v38 }
 0x2e8   : > { %v803_v40 = vpop.xlane.xlu1 %802 }
 0x2e9   : > { %v804_v41 = vmul.f32 0.03125, %v803_v40  ;;  %v776_v42 = vmul.f32 %v775_v39, %v775_v39 }
 0x2eb   : > { %v805_v43 = vsub.f32 %v691_v30, %v804_v41  ;;  %v777_v44 = vsel %vm515_vm0, %v776_v42, 0.0 }
 0x2ec   : > { %778 = vadd.xlane.f32.xlu0 %v777_v44 }
 0x2ed   : > { %v806_v45 = vmul.f32 %v805_v43, %v805_v43 }
 0x2ef   : > { %v807_v46 = vsel %vm515_vm0, %v806_v45, 0.0 }
 0x2f0   : > { %808 = vadd.xlane.f32.xlu1 %v807_v46 }
 0x375   : > { %v779_v47 = vpop.xlane.xlu0 %778 }
 0x376   : > { %v780_v48 = vmul.f32 0.03125, %v779_v47 }
 0x378   : > { %v781_v49 = vadd.f32 1e-05, %v780_v48 }
 0x379   : > { %v809_v50 = vpop.xlane.xlu1 %808 }
 0x37a   : > { %1247 = vrsqrt.f32 %v781_v49  ;;  %v810_v51 = vmul.f32 0.03125, %v809_v50 }
 0x37c   : > { %v811_v52 = vadd.f32 1e-05, %v810_v51 }
 0x37e   : > { %1249 = vrsqrt.f32 %v811_v52 }
 0x387   : > { %v1248_v53 = vpop.eup %1247 }
 0x388   : > { %v783_v55 = vmul.f32 %v1248_v53, %v775_v39 }
 0x38a   : > { %v790_v57 = vmul.f32 %v1078_v54, %v783_v55 }
 0x38b   : > { %v1250_v58 = vpop.eup %1249 }
 0x38c   : > { %v813_v60 = vmul.f32 %v1250_v58, %v805_v43  ;;  %v797_v61 = vadd.f32 %v1079_v56, %v790_v57 }
 0x38e   : > { %v820_v63 = vmul.f32 %v1080_v59, %v813_v60  ;;  %v798_v0 = vmul.f32 0.17677669, %v797_v61 }
 0x390   : > { %v827_v1 = vadd.f32 %v1081_v62, %v820_v63  ;;  %828 = vst.msk [vmem:[%s497_s2] sm:$0xff] %vm515_vm0, %v798_v0 }
 0x391   : > { %1370 = shalt.err (!%p1367_p12)
}
 0x392   : > { %s1371_s20 = scalar_lea.hbm %s1771_s24, 128  ;;  %s1375_s21 = scalar_lea.hbm %s1895_s10, 256 }
 0x393   : > { %p1372_p0 = scmp.ne.s32.totalorder %s1771_s24, %s1371_s20  ;;  %p1376_p8 = scmp.lt.s32.totalorder %s1771_s24, %s1895_s10 }
 0x394   : > { %p1377_p7 = scmp.lt.s32.totalorder %s1375_s21, %s1371_s20 }
 0x395   : > { %p1373_p3 = pnand %p1372_p0, %p1677_p5 }
 0x396   : > { %p1378_p11 = por %p1377_p7, %p1376_p8 }
 0x397   : > { %p1374_p10 = pneg %p1373_p3 }
 0x399   : > { %p1379_p1 = pnand %p1378_p11, %p1374_p10 }
 0x39b   : > { %1382 = shalt.err (!%p1379_p1)
}
 0x39c   : > { %1152 = dma.vmem_to_hbm [thread:$0]  (%p1677_p5), %s1773_s3, 128, %s1771_s24, %s832_s0  }
 0x39d   : > { %s1938_s4 = scalar_lea.vmem [#allocation11], %s1710_s19  ;;  %s1939_s5 = sand.u32 1, %s1610_s27  }
 0x39e   : > { %829 = vst.msk [vmem:[%s1938_s4] sm:$0xff] %vm515_vm0, %v827_v1  ;;  %s1816_s18 = scalar_lea.sflag [#allocation12], %s1939_s5  ;;  %s1383_s20 = scalar_lea.vmem %s1780_s30, 128 }
 0x39f   : > { %p1384_p9 = scmp.ne.s32.totalorder %s1780_s30, %s1383_s20  ;;  %s1512_s1 = smov [#allocation11]  }
 0x3a0   : > { %s1387_s2 = sshll.u32 %s1512_s1, 4  ;;  %s1388_s2 = int_to_ptr.vmem [resolvable:$false] %s1387_s2 }
 0x3a1   : > { %p1385_p13 = pnand %p1384_p9, %p1677_p5  ;;  %s1389_s21 = scalar_lea.vmem %s1388_s2, 256 }
 0x3a2   : > { %p1390_p4 = scmp.lt.s32.totalorder %s1780_s30, %s1388_s2  ;;  %p1391_p6 = scmp.lt.s32.totalorder %s1389_s21, %s1383_s20 }
 0x3a3   : > { %p1386_p2 = pneg %p1385_p13 }
 0x3a4   : > { %p1392_p12 = por %p1391_p6, %p1390_p4 }
 0x3a6   : > { %p1393_p0 = pnand %p1392_p12, %p1386_p2 }
 0x3a8   : > { %1396 = shalt.err (!%p1393_p0)
}
 0x3a9   : > { %s1397_s0 = scalar_lea.hbm %s1778_s29, 128  ;;  %s1401_s3 = scalar_lea.hbm %s1936_s12, 256 }
 0x3aa   : > { %p1398_p3 = scmp.ne.s32.totalorder %s1778_s29, %s1397_s0  ;;  %p1402_p7 = scmp.lt.s32.totalorder %s1778_s29, %s1936_s12 }
 0x3ab   : > { %p1403_p11 = scmp.lt.s32.totalorder %s1401_s3, %s1397_s0 }
 0x3ac   : > { %p1399_p10 = pnand %p1398_p3, %p1677_p5 }
 0x3ad   : > { %p1404_p1 = por %p1403_p11, %p1402_p7 }
 0x3ae   : > { %p1400_p8 = pneg %p1399_p10 }
 0x3b0   : > { %p1405_p9 = pnand %p1404_p1, %p1400_p8 }
 0x3b2   : > { %1408 = shalt.err (!%p1405_p9)
}
 0x3b3   : > { %1153 = dma.vmem_to_hbm [thread:$0]  (%p1677_p5), %s1780_s30, 128, %s1778_s29, %s1816_s18  }
 0x3b4   : > { %s1409_s13 = scalar_lea.vmem %s1788_s11, 128  ;;  %s1513_s4 = smov [#allocation13]  }
 0x3b5   : > { %p1410_p13 = scmp.ne.s32.totalorder %s1788_s11, %s1409_s13  ;;  %s1413_s5 = sshll.u32 %s1513_s4, 4  ;;  %s1414_s5 = int_to_ptr.vmem [resolvable:$false] %s1413_s5 }
 0x3b6   : > { %s1415_s20 = scalar_lea.vmem %s1414_s5, 256  ;;  %p1416_p6 = scmp.lt.s32.totalorder %s1788_s11, %s1414_s5 }
 0x3b7   : > { %p1411_p2 = pnand %p1410_p13, %p1677_p5  ;;  %p1417_p12 = scmp.lt.s32.totalorder %s1415_s20, %s1409_s13 }
 0x3b9   : > { %p1412_p4 = pneg %p1411_p2  ;;  %p1418_p0 = por %p1417_p12, %p1416_p6 }
 0x3bb   : > { %p1419_p3 = pnand %p1418_p0, %p1412_p4 }
 0x3bd   : > { %1422 = shalt.err (!%p1419_p3)
}
 0x3be   : > { %s1423_s1 = scalar_lea.hbm %s1786_s14, 128  ;;  %s1427_s2 = scalar_lea.hbm %s1937_s28, 256 }
 0x3bf   : > { %p1424_p10 = scmp.ne.s32.totalorder %s1786_s14, %s1423_s1  ;;  %p1428_p11 = scmp.lt.s32.totalorder %s1786_s14, %s1937_s28 }
 0x3c0   : > { %p1429_p1 = scmp.lt.s32.totalorder %s1427_s2, %s1423_s1 }
 0x3c1   : > { %p1425_p8 = pnand %p1424_p10, %p1677_p5 }
 0x3c2   : > { %p1430_p9 = por %p1429_p1, %p1428_p11 }
 0x3c3   : > { %p1426_p7 = pneg %p1425_p8 }
 0x3c5   : > { %p1431_p13 = pnand %p1430_p9, %p1426_p7 }
 0x3c7   : > { %1434 = shalt.err (!%p1431_p13)
}
 0x3c8   : > { %1154 = dma.vmem_to_hbm [thread:$0]  (%p1677_p5), %s1788_s11, 128, %s1786_s14, %s1816_s18  }
 0x3c9 PF: > { %s1940_s27 = sld [smem:[#allocation19_spill]]  ;;  %p1943_p4 = scmp.ge.s32.totalorder %s1501_s26, 2 }
 0x3ca   : > { %s1941_s19 = sld [smem:[#allocation20_spill]] }
 0x3cf   : > { %s896_s3 = sand.u32 1, %s1940_s27  }
 0x3d0   : > { %p1942_p2 = scmp.ne.s32.totalorder %s1941_s19, 0  ;;  %s897_s24 = scalar_lea.sflag [#allocation4], %s896_s3 }
 0x3d2   : > { %p1173_p6 = pnand %p1943_p4, %p1942_p2 }
 0x3d4   : > { %p1174_p12 = pneg %p1173_p6 }
 0x3d6   : > { %1472 = dma.done.wait (%p1174_p12), %s897_s24, 128  }
 0x3d7   : > { %1474 = vsyncadd (%p1174_p12), %s897_s24, 4294967168  ;;  %s1944_s15 = sadd.s32 4294967294, %s1501_s26  }
 0x3d8   : > { %s905_s13 = sand.u32 1, %s1944_s15  }
 0x3d9   : > { %s906_s16 = scalar_lea.sflag [#allocation12], %s905_s13 }
 0x3da   : > { %1476 = dma.done.wait (%p1174_p12), %s906_s16, 256  }
 0x3db   : > { %1478 = vsyncadd (%p1174_p12), %s906_s16, 4294967040  ;;  %s34_s26 = sadd.s32 1, %s1501_s26   ;;  %s1945_s11 = sld [smem:[#allocation21_spill]] }
 0x3dc   : > { %p31_p5 = scmp.ge.s32.totalorder %s34_s26, 4   ;;  %s1946_s21 = smov %s1485_s22 }
 0x3dd   : > { %s1947_s22 = smov %s1489_s23  ;;  %s1948_s23 = smov %s1689_s17 }
 0x3de   : > { %s1949_s24 = smov %s1497_s25  ;;  %33 = sbr.rel (!%p31_p5) target bundleno = 19 (0x13), region = 149 }
 0x3e1   : > { %s1950_s25 = smov %s1945_s11 }
 0x3e3   :  { %920 = vsyncpa [#allocation3], 1 }
 0x3e4   :  { %922 = vsyncpa [#allocation3 + $0x1], 1 }
 0x3e5   :  { %923 = vsyncpa [#allocation6], 1 }
 0x3e6   :  { %924 = vsyncpa [#allocation9], 1 }
 0x3e7   :  { %925 = vsyncpa [#allocation4], 1 }
 0x3e8   :  { %927 = vsyncpa [#allocation4 + $0x1], 1 }
 0x3e9   :  { %928 = vsyncpa [#allocation12], 1 }
 0x3ea   :  { %930 = vsyncpa [#allocation12 + $0x1], 1 }

</bundles_post_ra>
